<compile_context>
chip_gen: v5e
topology: v5e:2x2
jax: 0.10.0
libtpu: 0.0.40
codegen_flags: <defaults>
</compile_context>

<pallas_src>
import functools

import numpy as np
import jax
import jax.numpy as jnp
from jax.experimental import pallas as pl
from jax.experimental.pallas import tpu as pltpu


_VMEM_CAP = 48 << 20          # leave headroom below v7x's 64 MiB physical VMEM


def _round_up(x, m):
    return ((x + m - 1) // m) * m


# --------------------------------------------------------------------------
# Kernel 1: streaming sum over (n*t, H*W) -> (bb, 1, C) raw sums
# --------------------------------------------------------------------------
def _mean_sum_kernel(f_ref, ff_ref, acc_ref, *, tile_nt, nt_total, needs_mask):
    """f block: (tile_nt, tile_c, HW); ff block: (1, tile_c); acc scratch: (1, tile_c)."""
    r = pl.program_id(2)

    @pl.when(r == 0)
    def _():
        acc_ref[...] = jnp.zeros_like(acc_ref)

    blk = f_ref[...].astype(jnp.float32)                  # (tile_nt, tile_c, HW)
    if needs_mask:
        # Tail block on the nt axis: zero rows past nt_total (select, so any
        # garbage/NaN in the padded region is dropped).
        row = jax.lax.broadcasted_iota(jnp.int32, blk.shape, 0)
        blk = jnp.where(row + r * tile_nt < nt_total, blk, 0.0)

    s2 = jnp.sum(blk, axis=0)                             # (tile_c, HW)  VPU adds over nt
    # Lane (HW) reduction on the MXU: contract over s2's LAST dim (no XLU
    # transpose); the (1, tile_c) partial lands lane-dense on C — exactly the
    # layout the first Linear wants.
    ones_row = jnp.ones((1, s2.shape[1]), jnp.float32)
    acc_ref[...] += jax.lax.dot_general(
        ones_row, s2,
        dimension_numbers=(((1,), (1,)), ((), ())),
        preferred_element_type=jnp.float32)

    @pl.when(r == pl.num_programs(2) - 1)
    def _():
        ff_ref[...] = acc_ref[...]


# --------------------------------------------------------------------------
# Kernel 2: MLP + BCEWithLogits epilogue (runs once, whole arrays in VMEM)
# --------------------------------------------------------------------------
def _mlp_loss_kernel(*refs, n_hidden_layers, loss_weight, inv_r):
    ff_ref, label_ref = refs[0], refs[1]
    n_p = 2 * (n_hidden_layers + 1)
    p_refs = refs[2:2 + n_p]
    loss_ref, acc_ref = refs[2 + n_p], refs[3 + n_p]

    # temporal + spatial mean (divide by the full nt*H*W count exactly once).
    # GRL (gradient reversal) is identity in the forward pass.
    x = ff_ref[...] * inv_r                               # (bb, C)

    # Hidden layers: Linear -> ReLU.  Dropout (p=0.5) uses eval-mode identity.
    # TODO(synk): training-mode stochastic dropout masks are not reproduced.
    for i in range(n_hidden_layers):
        w, b = p_refs[2 * i], p_refs[2 * i + 1]
        x = jnp.dot(x, w[...], preferred_element_type=jnp.float32) + b[...]
        x = jnp.maximum(x, 0.0)
    w, b = p_refs[-2], p_refs[-1]
    score = jnp.dot(x, w[...], preferred_element_type=jnp.float32) + b[...]   # (bb, 1)

    y = label_ref[...]                                    # (bb, 1) float32 in {0, 1}
    # BCEWithLogitsLoss (mean reduction), numerically stable:
    #   max(x, 0) - x*y + log(1 + exp(-|x|))
    bce = jnp.maximum(score, 0.0) - score * y + jnp.log1p(jnp.exp(-jnp.abs(score)))
    loss_ref[...] = loss_weight * jnp.mean(bce, keepdims=True)

    correct = ((score > 0.0) == (y > 0.5)).astype(jnp.float32)
    acc_ref[...] = jnp.mean(correct, keepdims=True)


# --------------------------------------------------------------------------
# Wrapper
# --------------------------------------------------------------------------
def init_params(key, in_channels, hidden_dim, num_layers=4, init_std=0.001):
    """normal_init(std=init_std) for weights, zeros for biases (deterministic)."""
    dims = [in_channels] + [hidden_dim] * num_layers + [1]
    params = []
    keys = jax.random.split(key, len(dims) - 1)
    for k, (din, dout) in zip(keys, zip(dims[:-1], dims[1:])):
        w = init_std * jax.random.normal(k, (din, dout), dtype=jnp.float32)
        b = jnp.zeros((1, dout), dtype=jnp.float32)
        params.append((w, b))
    return params


def domain_classifier_forward(f, source_mask, params, *, num_segments,
                              loss_weight=1.0, train=True, nickname=''):
    """Mirrors DomainClassifier.forward (backbone='TSM', contrastive=False)."""
    if not train:
        return f, None

    bbnt, C, H, W = f.shape
    nt = num_segments * 1          # t == 1 in the einops reduce pattern
    assert bbnt % nt == 0
    bb = bbnt // nt
    HW = H * W
    R = nt * HW

    # Transpose-free view: '(bb n t) c h w' -> (bb, n*t, c, h*w).  Pure reshape.
    f_k = f.reshape(bb, nt, C, HW)
    label = source_mask.astype(jnp.float32).reshape(bb, 1)

    # ---------------- kernel 1: streaming reduction ----------------
    itemsize = jnp.dtype(f_k.dtype).itemsize
    sublane = 8 * max(1, 4 // itemsize)            # 8 for f32, 16 for bf16, 32 for i8
    hw_pad = _round_up(HW, 128)

    def padded_block_bytes(t_nt, t_c):
        # Real VMEM footprint of one (t_nt, t_c, HW) input block after padding.
        return t_nt * _round_up(t_c, sublane) * hw_pad * itemsize

    budget = 8 << 20                               # per-block padded bytes

    # Tile C only if a single nt-row of the full channel slab blows the budget.
    tile_c = C
    if padded_block_bytes(1, C) > budget and C % 128 == 0:
        tile_c = 128
        for mult in range(C // 128, 0, -1):
            cand = mult * 128
            if C % cand == 0 and padded_block_bytes(1, cand) <= budget:
                tile_c = cand
                break
    n_c = pl.cdiv(C, tile_c)                       # tile_c divides C by construction

    # Largest tile_nt (<= nt) that fits the padded budget; tail masked if needed.
    tile_nt = int(max(1, min(nt, budget // max(1, padded_block_bytes(1, tile_c)))))
    n_r = pl.cdiv(nt, tile_nt)
    needs_mask = (nt % tile_nt) != 0

    block_bytes = padded_block_bytes(tile_nt, tile_c)
    out_blk_bytes = 8 * _round_up(tile_c, 128) * 4            # padded (1, tile_c) f32
    vmem1 = 2 * block_bytes + 3 * out_blk_bytes + (2 << 20)   # 2x in, 2x out, 1x scratch
    vmem1 = int(min(_VMEM_CAP, max(16 << 20, vmem1)))

    sum_cost = pl.CostEstimate(
        flops=int(2 * bb * C * R),
        transcendentals=0,
        bytes_accessed=int(f_k.size * itemsize + bb * C * 4))

    kernel1 = functools.partial(_mean_sum_kernel,
                                tile_nt=tile_nt,
                                nt_total=int(nt),
                                needs_mask=bool(needs_mask))

    ff_sum = pl.pallas_call(
        kernel1,
        out_shape=jax.ShapeDtypeStruct((bb, 1, C), jnp.float32),
        grid=(bb, n_c, n_r),
        in_specs=[pl.BlockSpec((None, tile_nt, tile_c, HW),
                               lambda b, c, r: (b, r, c, 0))],
        out_specs=pl.BlockSpec((None, 1, tile_c), lambda b, c, r: (b, 0, c)),
        scratch_shapes=[pltpu.VMEM((1, tile_c), jnp.float32)],
        compiler_params=pltpu.CompilerParams(
            dimension_semantics=("parallel", "parallel", "arbitrary"),
            vmem_limit_bytes=vmem1),
        cost_estimate=sum_cost,
    )(f_k)

    ff_sum = ff_sum.reshape(bb, C)                 # free reshape

    # ---------------- kernel 2: MLP + loss epilogue ----------------
    flat_params = [p for wb in params for p in wb]
    n_hidden = len(params) - 1

    kernel2 = functools.partial(_mlp_loss_kernel,
                                n_hidden_layers=n_hidden,
                                loss_weight=float(loss_weight),
                                inv_r=1.0 / float(R))

    def padded2d_bytes(shape):
        r, c = shape
        return _round_up(r, 8) * _round_up(c, 128) * 4

    param_bytes = sum(padded2d_bytes(p.shape) for p in flat_params)
    max_width = max(int(w.shape[1]) for w, _ in params)
    act_bytes = 2 * padded2d_bytes((bb, max_width))           # two live activations
    io_bytes = padded2d_bytes((bb, C)) + padded2d_bytes((bb, 1)) + 2 * padded2d_bytes((1, 1))
    # No grid -> full-array VMEM blocks are NOT double-buffered; no 2x factor.
    vmem2 = int(min(_VMEM_CAP, max(8 << 20,
                                   param_bytes + act_bytes + io_bytes + (2 << 20))))

    mlp_cost = pl.CostEstimate(
        flops=int(2 * bb * sum(int(w.shape[0]) * int(w.shape[1]) for w, _ in params)),
        transcendentals=int(2 * bb),
        bytes_accessed=int(param_bytes + bb * C * 4 + bb * 4 + 8))

    vmem_spec = pl.BlockSpec(memory_space=pltpu.MemorySpace.VMEM)
    n_in = 2 + len(flat_params)
    loss, acc = pl.pallas_call(
        kernel2,
        out_shape=(jax.ShapeDtypeStruct((1, 1), jnp.float32),
                   jax.ShapeDtypeStruct((1, 1), jnp.float32)),
        in_specs=[vmem_spec] * n_in,
        out_specs=(vmem_spec, vmem_spec),
        compiler_params=pltpu.CompilerParams(vmem_limit_bytes=vmem2),
        cost_estimate=mlp_cost,
    )(ff_sum, label, *flat_params)

    suffix = '_' + nickname if nickname else ''
    losses = {f'loss_dom{suffix}': loss[0, 0], f'acc_dom{suffix}': acc[0, 0]}
    return f, losses


if __name__ == "__main__":
    key = jax.random.PRNGKey(0)
    k_f, k_p = jax.random.split(key)

    # Small shapes consistent with the module:
    bb = 2            # batch of videos
    num_segments = 4  # TSM segments (n), t = 1
    C = 16            # in_channels
    H = W = 8         # spatial
    hidden_dim = 32
    num_layers = 4

    # PyTorch-style NCHW feature map: (bb * n * t, C, H, W)
    f = jax.random.normal(k_f, (bb * num_segments, C, H, W), dtype=jnp.float32)

    # domains array of strings, as in the PyTorch module
    domains = np.array(['source', 'target'])
    source_mask = jnp.asarray(domains == 'source')

    params = init_params(k_p, C, hidden_dim, num_layers=num_layers, init_std=0.001)

    out_f, losses = domain_classifier_forward(
        f, source_mask, params,
        num_segments=num_segments, loss_weight=1.0, train=True)

    jax.block_until_ready((out_f, losses))
    assert out_f.shape == f.shape
    assert jnp.isfinite(losses['loss_dom']) and jnp.isfinite(losses['acc_dom'])
    assert 0.0 <= float(losses['acc_dom']) <= 1.0

    # Pure-JAX reference check (forward math, eval-mode dropout).
    ff_ref = f.reshape(bb, num_segments, C, H * W).mean(axis=(1, 3))
    x_ref = ff_ref
    for w_, b_ in params[:-1]:
        x_ref = jnp.maximum(x_ref @ w_ + b_, 0.0)
    score_ref = x_ref @ params[-1][0] + params[-1][1]
    y_ref = source_mask.astype(jnp.float32).reshape(bb, 1)
    loss_ref = jnp.mean(jnp.maximum(score_ref, 0.0) - score_ref * y_ref
                        + jnp.log1p(jnp.exp(-jnp.abs(score_ref))))
    acc_ref = jnp.mean(((score_ref > 0.0) == (y_ref > 0.5)).astype(jnp.float32))
    np.testing.assert_allclose(float(losses['loss_dom']), float(loss_ref),
                               rtol=1e-4, atol=1e-6)
    np.testing.assert_allclose(float(losses['acc_dom']), float(acc_ref),
                               rtol=0, atol=0)

    print("KERNEL_OK")
</pallas_src>

<mosaic_0001>
module attributes {stable_mosaic.version = 11 : i64} {
  func.func @_mean_sum_kernel(%arg0: i32, %arg1: i32, %arg2: i32, %arg3: memref<1x4x16x64xf32, #tpu.memory_space<vmem>>, %arg4: memref<1x1x16xf32, #tpu.memory_space<vmem>>, %arg5: memref<1x16xf32, #tpu.memory_space<vmem>>) attributes {dimension_semantics = [#tpu.dimension_semantics<parallel>, #tpu.dimension_semantics<parallel>, #tpu.dimension_semantics<arbitrary>], iteration_bounds = array<i64: 2, 1, 1>, scalar_prefetch = 0 : i64, scratch_operands = 1 : i64, tpu.core_type = #tpu.core_type<tc>, window_params = [{transform_indices = @transform_0, window_bounds = array<i64: 1, 4, 16, 64>}, {transform_indices = @transform_1, window_bounds = array<i64: 1, 1, 16>}]} {
    %c0_i32 = arith.constant 0 : i32
    %0 = arith.cmpi eq, %arg2, %c0_i32 : i32
    %1 = arith.extui %0 : i1 to i32
    %c0_i32_0 = arith.constant 0 : i32
    %2 = arith.cmpi ne, %1, %c0_i32_0 : i32
    scf.if %2 {
      %cst_12 = arith.constant 0.000000e+00 : f32
      %14 = vector.broadcast %cst_12 : f32 to vector<1x16xf32>
      %c0_13 = arith.constant 0 : index
      %c0_14 = arith.constant 0 : index
      %15 = vector.load %arg5[%c0_13, %c0_14] : memref<1x16xf32, #tpu.memory_space<vmem>>, vector<1x16xf32>
      tpu.vector_store %arg5[%c0_13, %c0_14], %14 {strides = array<i32>} : memref<1x16xf32, #tpu.memory_space<vmem>>, vector<1x16xf32>,
    } else {
    }
    %c0 = arith.constant 0 : index
    %c0_1 = arith.constant 0 : index
    %c0_2 = arith.constant 0 : index
    %c0_3 = arith.constant 0 : index
    %3 = vector.load %arg3[%c0, %c0_1, %c0_2, %c0_3] : memref<1x4x16x64xf32, #tpu.memory_space<vmem>>, vector<1x4x16x64xf32>
    %4 = vector.shape_cast %3 : vector<1x4x16x64xf32> to vector<4x16x64xf32>
    %cst = arith.constant dense<0.000000e+00> : vector<16x64xf32>
    %5 = vector.multi_reduction <add>, %4, %cst [0] : vector<4x16x64xf32> to vector<16x64xf32>
    %cst_4 = arith.constant 1.000000e+00 : f32
    %6 = vector.broadcast %cst_4 : f32 to vector<1x64xf32>
    %c0_5 = arith.constant 0 : index
    %c0_6 = arith.constant 0 : index
    %7 = vector.load %arg5[%c0_5, %c0_6] : memref<1x16xf32, #tpu.memory_space<vmem>>, vector<1x16xf32>
    %cst_7 = arith.constant dense<0.000000e+00> : vector<1x16xf32>
    %8 = tpu.matmul %6, %5, %cst_7 {dimension_numbers = #tpu.dot_dimension_numbers<[1], [1], [0], [0], [0, 0, 1, 0], [], []>} : vector<1x64xf32>, vector<16x64xf32>, vector<1x16xf32> -> vector<1x16xf32>
    %9 = arith.addf %7, %8 : vector<1x16xf32>
    %c0_8 = arith.constant 0 : index
    %c0_9 = arith.constant 0 : index
    %10 = vector.load %arg5[%c0_8, %c0_9] : memref<1x16xf32, #tpu.memory_space<vmem>>, vector<1x16xf32>
    tpu.vector_store %arg5[%c0_8, %c0_9], %9 {strides = array<i32>} : memref<1x16xf32, #tpu.memory_space<vmem>>, vector<1x16xf32>,
    %c0_i32_10 = arith.constant 0 : i32
    %11 = arith.cmpi eq, %arg2, %c0_i32_10 : i32
    %12 = arith.extui %11 : i1 to i32
    %c0_i32_11 = arith.constant 0 : i32
    %13 = arith.cmpi ne, %12, %c0_i32_11 : i32
    scf.if %13 {
      %c0_12 = arith.constant 0 : index
      %c0_13 = arith.constant 0 : index
      %14 = vector.load %arg5[%c0_12, %c0_13] : memref<1x16xf32, #tpu.memory_space<vmem>>, vector<1x16xf32>
      %c0_14 = arith.constant 0 : index
      %c0_15 = arith.constant 0 : index
      %c0_16 = arith.constant 0 : index
      %15 = vector.load %arg4[%c0_14, %c0_15, %c0_16] : memref<1x1x16xf32, #tpu.memory_space<vmem>>, vector<1x1x16xf32>
      %16 = vector.shape_cast %15 : vector<1x1x16xf32> to vector<1x16xf32>
      %17 = vector.shape_cast %14 : vector<1x16xf32> to vector<1x1x16xf32>
      tpu.vector_store %arg4[%c0_14, %c0_15, %c0_16], %17 {strides = array<i32>} : memref<1x1x16xf32, #tpu.memory_space<vmem>>, vector<1x1x16xf32>,
    } else {
    }
    return
  }
  func.func @transform_0(%arg0: i32, %arg1: i32, %arg2: i32) -> (i32, i32, i32, i32) {
    %c0_i32 = arith.constant 0 : i32
    %c0_i32_0 = arith.constant 0 : i32
    return %arg0, %arg2, %arg1, %c0_i32 : i32, i32, i32, i32
  }
  func.func @transform_1(%arg0: i32, %arg1: i32, %arg2: i32) -> (i32, i32, i32) {
    %c0_i32 = arith.constant 0 : i32
    %c0_i32_0 = arith.constant 0 : i32
    return %arg0, %c0_i32, %arg1 : i32, i32, i32
  }
}

</mosaic_0001>

<bundles_post_ra>
// kernel: tpu_custom_call.1
= control target key start
LH: loop header
LB: loop body
LE: loop exit
PB: predicated region body
PF: predicated region fallthrough
CT: control target
= control target key end

     0   :  { %6 = vsyncpa [#allocation4], 0  ;;  %s676_s0 = inlined_call_operand.hbm [shape: f32[2,4,16,64], index: 0, kind: input, shape index: {}]   ;;  %s677_s1 = inlined_call_operand.hbm [shape: f32[2,1,16], index: 1, kind: output, shape index: {}]  }
   0x1   :  { %8 = vsyncpa [#allocation4 + $0x1], 0 }
   0x2   :  { %9 = vsyncpa [#allocation5], 0 }
   0x3   :  { %11 = vsyncpa [#allocation5 + $0x1], 0  ;;  %s541_s6 = smov 0   ;;  %s543_s7 = smov 0  }
   0x4   :  { %s545_s8 = smov 0   ;;  %s547_s9 = smov 0  }
   0x5   :  { %s549_s10 = smov 0   ;;  %s551_s11 = smov 0  }
   0x6 LB: > { %s332_s12 = sadd.s32 4294967295, %s525_s11   ;;  %s333_s13 = sadd.s32 4294967294, %s525_s11   ;;  %s525_s11 = sphi %s551_s11, %s17_s11   ;;  %s521_s10 = sphi %s549_s10, %s686_s10   ;;  %s517_s9 = sphi %s547_s9, %s685_s9   ;;  %s513_s8 = sphi %s545_s8, %s684_s8   ;;  %s509_s7 = sphi %s543_s7, %s683_s7   ;;  %s505_s6 = sphi %s541_s6, %s682_s6  }
   0x7   : > { %s36_s14 = sadd.s32 1, %s521_s10  ;;  %s47_s15 = sadd.s32 1, %s513_s8 }
   0x8   : > { %p38_p0 = scmp.ge.s32.totalorder %s36_s14, 2  ;;  %p54_p1 = scmp.ne.s32.totalorder %s513_s8, %s509_s7 }
   0x9   : > { %p55_p2 = scmp.eq.s32.totalorder %s525_s11, 0  ;;  %p60_p3 = scmp.ne.s32.totalorder %s509_s7, %s505_s6 }
   0xa   : > { %s688_s14 = smov (%p38_p0, %s36_s14), 0  ;;  %p61_p5 = scmp.eq.s32.totalorder %s332_s12, 0 }
   0xb   : > { %p582_p4 = por %p55_p2, %p54_p1  ;;  %s40_s17 = ssub.s32 %s521_s10, %s688_s14 }
   0xc   : > { %p86_p6 = scmp.eq.s32.totalorder %s332_s12, 1  ;;  %p45_p7 = scmp.eq.s32.totalorder %s40_s17, 0 }
   0xd   : > { %p588_p8 = por %p61_p5, %p60_p3  ;;  %p92_p10 = scmp.eq.s32.totalorder %s333_s13, 1 }
   0xe   : > { %p592_p9 = por %p86_p6, %p54_p1  ;;  %p335_p12 = scmp.ge.s32.totalorder %s525_s11, 2 }
   0xf   : > { %s597_s20 = scalar_select %p45_p7, %s513_s8, %s47_s15  }
  0x10   : > { %p599_p11 = por %p92_p10, %p60_p3  ;;  %p359_p13 = scmp.lt.s32.totalorder %s525_s11, 2 }
  0x11   : > { %s112_s22 = sand.u32 1, %s513_s8   ;;  %s346_s24 = sshll.u32 %s521_s10, 6 }
  0x12   : > { %s336_s23 = sshll.u32 %s112_s22, 6  ;;  %s126_s27 = scalar_lea.hbm %s676_s0, %s346_s24 }
  0x13   : > { %s116_s28 = scalar_lea.vmem [#allocation3], %s336_s23  ;;  %s127_s30 = sshll.u32 %s126_s27, 4  ;;  %s128_s30 = int_to_ptr.hbm [resolvable:$true] %s127_s30 }
  0x14   : > { %s129_s29 = sshll.u32 %s116_s28, 4  ;;  %p352_p0 = pnand %p359_p13, %p582_p4  ;;  %s130_s29 = int_to_ptr.vmem [resolvable:$true] %s129_s29 }
  0x15   : > { %p339_p1 = scmp.ge.s32.totalorder %s525_s11, 1  ;;  %s113_s2 = scalar_lea.sflag [#allocation4], %s112_s22 }
  0x16   : > { %s527_s3 = smov 128   ;;  %s528_s4 = smov 8  }
  0x17   : > { %354 = dma.hbm_to_vmem [thread:$0]  (!%p352_p0), %s128_s30, 1024, %s130_s29, %s113_s2, %s527_s3, %s527_s3, %s528_s4  }
  0x18   : > { %p137_p2 = scmp.lt.s32.totalorder %s525_s11, 3 }
  0x1a   : > { %p138_p3 = pnand %p339_p1, %p137_p2 }
  0x1b   : > { %s615_s5 = sand.u32 (!%p138_p3), 1, %s509_s7  }
  0x1c   : > { %141 = sbr.rel (%p138_p3) target bundleno = 188 (0xbc), region = 24  ;;  %s340_s12 = sshll.u32 (!%p138_p3), %s615_s5, 6 }
  0x1d   : > { %s144_s13 = scalar_lea.sflag (!%p138_p3), [#allocation4], %s615_s5  ;;  %s147_s15 = scalar_lea.vmem (!%p138_p3), [#allocation3], %s340_s12 }
  0x21   : > { %496 = dma.done.wait (%p588_p8), %s144_s13, 1024  }
  0x22   : > { %498 = vsyncadd (%p588_p8), %s144_s13, 4294966272  ;;  %vm172_vm0 = vcmask 122880   ;;  %v529_v0 = vmov 0.0   ;;  %vm182_vm1 = vcmask 523264   ;;  %v175_v1 = vld [vmem:[%s147_s15 + $0x8] sm:$0xff]  ;;  %v177_v2 = vld [vmem:[%s147_s15 + $0x18] sm:$0xff]  ;;  %s245_s18 = scalar_lea.hbm %s677_s1, %s517_s9 }
  0x23   : > { %173 = vst.msk [vmem:[#allocation2] sm:$0x1] %vm172_vm0, %v529_v0  ;;  %v179_v3 = vld [vmem:[%s147_s15 + $0x28] sm:$0xff]  ;;  %v181_v4 = vld [vmem:[%s147_s15 + $0x38] sm:$0xff]  ;;  %v190_v5 = vsel %vm182_vm1, %v175_v1, 0.0  ;;  %v191_v6 = vsel %vm182_vm1, %v177_v2, 0.0 }
  0x24   : > { %v193_v7 = vsel %vm182_vm1, %v179_v3, 0.0  ;;  %v174_v8 = vld [vmem:[%s147_s15] sm:$0xff]  ;;  %v176_v9 = vld [vmem:[%s147_s15 + $0x10] sm:$0xff]  ;;  %v192_v10 = vadd.f32 %v191_v6, %v190_v5  ;;  %v195_v15 = vsel %vm182_vm1, %v181_v4, 0.0  ;;  %v530_v23 = vmov 1.0   ;;  %s165_s22 = scalar_lea.vmem [#allocation6], %s615_s5 }
  0x25   : > { %v178_v11 = vld [vmem:[%s147_s15 + $0x20] sm:$0xff]  ;;  %v180_v12 = vld [vmem:[%s147_s15 + $0x30] sm:$0xff]  ;;  %v183_v13 = vsel %vm182_vm1, %v174_v8, 0.0  ;;  %v184_v14 = vsel %vm182_vm1, %v176_v9, 0.0  ;;  %s247_s23 = sshll.u32 %s165_s22, 4  ;;  %s249_s24 = sshll.u32 %s245_s18, 4  ;;  %s248_s23 = int_to_ptr.vmem [resolvable:$true] %s247_s23  ;;  %s250_s24 = int_to_ptr.hbm [resolvable:$true] %s249_s24 }
  0x26   : > { %v185_v16 = vadd.f32 %v184_v14, %v183_v13  ;;  %v186_v17 = vsel %vm182_vm1, %v178_v11, 0.0  ;;  %v194_v18 = vadd.f32 %v193_v7, %v192_v10  ;;  %v188_v20 = vsel %vm182_vm1, %v180_v12, 0.0  ;;  %s236_s25 = scalar_lea.sflag [#allocation5], %s615_s5  ;;  %s457_s26 = sshra.s32 %s250_s24, 4  ;;  %s458_s26 = int_to_ptr.hbm [resolvable:$true] %s457_s26 }
  0x27   : > { %s459_s27 = scalar_lea.hbm %s458_s26, 1  ;;  %s463_s9 = scalar_lea.hbm %s677_s1, 2 }
  0x28   : > { %v187_v19 = vadd.f32 %v186_v17, %v185_v16  ;;  %v196_v21 = vadd.f32 %v195_v15, %v194_v18  ;;  %p460_p4 = scmp.ne.s32.totalorder %s458_s26, %s459_s27  ;;  %p464_p7 = scmp.lt.s32.totalorder %s458_s26, %s677_s1 }
  0x29   : > { %p465_p8 = scmp.lt.s32.totalorder %s463_s9, %s459_s27 }
  0x2a   : > { %341 = vmatpush.xpose.msk.msra.mxu0 %vm182_vm1, %v196_v21  ;;  %v189_v22 = vadd.f32 %v188_v20, %v187_v19  ;;  %v197_v24 = vld [vmem:[#allocation2] sm:$0x1]  ;;  %p461_p5 = pnand %p460_p4, %p592_p9 }
  0x2b   : > { %p466_p10 = por %p465_p8, %p464_p7 }
  0x2c   : > { %p462_p6 = pneg %p461_p5 }
  0x2e   : > { %342 = vmatpush.xpose.msk.msra.mxu0 %vm182_vm1, %v189_v22  ;;  %p467_p13 = pnand %p466_p10, %p462_p6 }
  0x31   : > { %343 = vmatmul.msk.f32.vlgmr.msra.gmra.mxu0 %vm182_vm1, %v530_v23 }
  0xae   : > { %v224_v25 = vpop.f32.mrf.mxu0 }
  0xaf   : > { %v227_v26 = vadd.f32 %v224_v25, %v197_v24 }
  0xb1   : > { %229 = vst.msk [vmem:[#allocation2] sm:$0x1] %vm172_vm0, %v227_v26 }
  0xb8   : > { %v233_v27 = vld [vmem:[#allocation2] sm:$0x1] }
  0xb9   : > { %234 = vst.msk [vmem:[%s165_s22] sm:$0x1] %vm172_vm0, %v233_v27 }
  0xba   : > { %470 = shalt.err (!%p467_p13)
}
  0xbb   : > { %349 = dma.vmem_to_hbm [thread:$0]  (%p592_p9), %s248_s23, 16, %s250_s24, %s236_s25  }
  0xbc PF: > { %s261_s3 = sand.u32 1, %s505_s6   ;;  %p356_p0 = pnand %p335_p12, %p599_p11 }
  0xbd   : > { %s262_s4 = scalar_lea.sflag [#allocation5], %s261_s3 }
  0xbe   : > { %p357_p1 = pneg %p356_p0 }
  0xc0   : > { %500 = dma.done.wait (%p357_p1), %s262_s4, 16  }
  0xc1   : > { %502 = vsyncadd (%p357_p1), %s262_s4, 4294967280  ;;  %s17_s11 = sadd.s32 1, %s525_s11   ;;  %s682_s6 = smov %s509_s7 }
  0xc2   : > { %p14_p2 = scmp.ge.s32.totalorder %s17_s11, 4   ;;  %s683_s7 = smov %s513_s8 }
  0xc3   : > { %s684_s8 = smov %s597_s20  ;;  %s685_s9 = smov %s521_s10 }
  0xc4   : > { %s686_s10 = smov %s688_s14  ;;  %16 = sbr.rel (!%p14_p2) target bundleno = 6 (0x6), region = 77 }
  0xc9   :  { %267 = vsyncpa [#allocation4], 1 }
  0xca   :  { %269 = vsyncpa [#allocation4 + $0x1], 1 }
  0xcb   :  { %270 = vsyncpa [#allocation5], 1 }
  0xcc   :  { %272 = vsyncpa [#allocation5 + $0x1], 1 }

</bundles_post_ra>
